<compile_context>
chip_gen: v7x
topology: tpu7x:2x2x1
jax: 0.10.0
libtpu: 0.0.40
codegen_flags: <defaults>
</compile_context>

<pallas_src>
import math

import jax
import jax.numpy as jnp
from jax.experimental import pallas as pl
from jax.experimental.pallas import tpu as pltpu


def _mlm_head_kernel(x_ref, w1_ref, b1_ref, gamma_ref, beta_ref,
                     w2_ref, b2_ref, o_ref, h_ref):
    """One (row-tile i, vocab-tile j) grid step.

    Vocab axis (j) is innermost and 'arbitrary': the transform result h is
    computed only at j == 0 and cached (in the decoder-weight dtype) in the
    VMEM scratch h_ref, then reused for every vocab tile.
    """
    @pl.when(pl.program_id(1) == 0)
    def _():
        # dense: [tm, H] @ [H, H] -> f32 accumulation on the MXU.
        h = jnp.dot(x_ref[...], w1_ref[...],
                    preferred_element_type=jnp.float32)
        h = h + b1_ref[...].astype(jnp.float32)
        # exact (erf-form) GELU, as in pretrain_bert.py's gelu.
        h = h * 0.5 * (1.0 + jax.lax.erf(h * (1.0 / math.sqrt(2.0))))
        # BertLayerNorm: biased variance, eps=1e-12 inside the sqrt.
        mean = jnp.mean(h, axis=-1, keepdims=True)
        var = jnp.mean((h - mean) ** 2, axis=-1, keepdims=True)
        h = (h - mean) * jax.lax.rsqrt(var + 1e-12)   # rsqrt -> EUP slot
        h = (gamma_ref[...].astype(jnp.float32) * h
             + beta_ref[...].astype(jnp.float32))
        # Single cast here; every vocab tile reuses h at the MXU-native dtype.
        h_ref[...] = h.astype(h_ref.dtype)

    # decoder: [tm, H] @ [H, tn] + [1, tn]; f32 accumulation, cast on store.
    o_ref[...] = (jnp.dot(h_ref[...], w2_ref[...],
                          preferred_element_type=jnp.float32)
                  + b2_ref[...].astype(jnp.float32)).astype(o_ref.dtype)


def _round_up(x, m):
    return ((x + m - 1) // m) * m


def _choose_row_tile(M, target):
    """Row tile: big (weight-traffic lever), multiple of 8, >=2 tiles when big."""
    if M <= target:
        if M >= 1024 and M % 16 == 0:
            return M // 2          # >= 2 row tiles so 'parallel' splits on v7x
        return M                   # single full-extent tile (small/demo shapes)
    # Prefer a divisor of M near the target so no row padding is needed.
    t = (target // 8) * 8
    floor = max(256, target // 4)
    while t >= floor:
        if M % t == 0:
            return t
        t -= 8
    return (target // 8) * 8       # fall back to padding M up to a multiple


def _choose_vocab_tile(V, target):
    if V <= target:
        return V                   # single full-width tile
    return max((target // 128) * 128, 128)


def masked_word_predictions(hidden_states, params, *, tm=1024, tn=1024,
                            out_dtype=jnp.float32):
    """hidden_states: [B, S, H] -> logits [B, S, V] in out_dtype."""
    B, S, H = hidden_states.shape
    V = params["w_dec"].shape[1]
    M = B * S

    w_dtype = params["w_dense"].dtype
    dec_dtype = params["w_dec"].dtype

    tm = _choose_row_tile(M, tm)
    tn = _choose_vocab_tile(V, tn)
    Mp = _round_up(M, tm)
    Vp = _round_up(V, tn)

    # Stream activations in the dense-weight dtype (bf16 path -> native MXU rate).
    x2d = hidden_states.reshape(M, H).astype(w_dtype)
    if Mp != M:
        x2d = jnp.pad(x2d, ((0, Mp - M), (0, 0)))

    # Pad the vocab axis with zero weight columns / zero bias; padded logits
    # are sliced off below, so the values never escape.
    w_dec = params["w_dec"]
    bias = params["bias"]
    if Vp != V:
        w_dec = jnp.pad(w_dec, ((0, 0), (0, Vp - V)))
        bias = jnp.pad(bias, ((0, 0), (0, Vp - V)))

    # --- generation-aware VMEM budget -------------------------------------
    w_item = jnp.dtype(w_dtype).itemsize
    dec_item = jnp.dtype(dec_dtype).itemsize
    out_item = jnp.dtype(out_dtype).itemsize
    est = (2 * tm * H * w_item           # x row tile (double-buffered)
           + 1 * H * H * w_item          # dense weight (grid-invariant, 1 buf)
           + 3 * H * tn * dec_item       # decoder weight tile (3 bufs)
           + 2 * tm * tn * out_item      # output tile
           + 2 * tn * 4 + 6 * H * 4      # biases / gamma / beta
           + tm * H * dec_item)          # cached transform scratch
    try:
        vmem_cap = int(pltpu.get_tpu_info().vmem_capacity_bytes)
    except Exception:
        vmem_cap = 64 * 1024 * 1024      # conservative (v7x-sized) fallback
    vmem_ceiling = int(0.85 * vmem_cap)  # leave compiler-scratch headroom
    vmem_limit = int(min(max(int(1.5 * est), 32 * 1024 * 1024), vmem_ceiling))

    # --- specs / call ------------------------------------------------------
    def _build_specs(with_pipeline_modes):
        def spec(shape, index_map, buffers=None):
            if buffers is not None and with_pipeline_modes:
                return pl.BlockSpec(shape, index_map,
                                    pipeline_mode=pl.Buffered(buffers))
            return pl.BlockSpec(shape, index_map)

        in_specs = [
            spec((tm, H), lambda i, j: (i, 0)),              # x row tile
            spec((H, H), lambda i, j: (0, 0), buffers=1),    # dense weight (pre-T), invariant
            spec((1, H), lambda i, j: (0, 0), buffers=1),    # dense bias
            spec((1, H), lambda i, j: (0, 0), buffers=1),    # LayerNorm gamma
            spec((1, H), lambda i, j: (0, 0), buffers=1),    # LayerNorm beta
            spec((H, tn), lambda i, j: (0, j), buffers=3),   # decoder weight tile (streamed)
            spec((1, tn), lambda i, j: (0, j)),              # output bias tile
        ]
        out_specs = pl.BlockSpec((tm, tn), lambda i, j: (i, j))
        return in_specs, out_specs

    def _run(with_pipeline_modes):
        in_specs, out_specs = _build_specs(with_pipeline_modes)
        return pl.pallas_call(
            _mlm_head_kernel,
            out_shape=jax.ShapeDtypeStruct((Mp, Vp), out_dtype),
            grid_spec=pltpu.PrefetchScalarGridSpec(
                num_scalar_prefetch=0,
                grid=(Mp // tm, Vp // tn),
                in_specs=in_specs,
                out_specs=out_specs,
                # cached transform, stored at the decoder-weight dtype
                scratch_shapes=[pltpu.VMEM((tm, H), dec_dtype)],
            ),
            compiler_params=pltpu.CompilerParams(
                # Row axis independent (shards across v7x's 2 TCs); vocab axis
                # carries the h scratch so it must stay 'arbitrary' (inner).
                dimension_semantics=("parallel", "arbitrary"),
                vmem_limit_bytes=vmem_limit,
            ),
        )(x2d, params["w_dense"], params["b_dense"], params["gamma"],
          params["beta"], w_dec, bias)

    try:
        out2d = _run(True)
    except Exception:
        # TODO(synk): drop explicit pl.Buffered counts if this jax build
        # rejects them; default double-buffering is a correct (slower) path.
        out2d = _run(False)

    return out2d[:M, :V].reshape(B, S, V)


def init_params(key, hidden_size, vocab_size, weight_dtype=jnp.float32):
    """Deterministic synthetic parameters (shapes from the module __init__).

    nn.Linear weights are [out, in]; stored pre-transposed as [in, out] so the
    kernel does a plain row-major matmul. Weight matrices may be stored in
    bf16 for streaming; biases / LN params stay f32.
    """
    k1, k2, k3 = jax.random.split(key, 3)
    scale = 0.02
    return {
        "w_dense": (scale * jax.random.normal(
            k1, (hidden_size, hidden_size), jnp.float32)).astype(weight_dtype),
        "b_dense": scale * jax.random.normal(k2, (1, hidden_size), jnp.float32),
        "gamma": jnp.ones((1, hidden_size), jnp.float32),    # BertLayerNorm init
        "beta": jnp.zeros((1, hidden_size), jnp.float32),
        "w_dec": (scale * jax.random.normal(
            k3, (hidden_size, vocab_size), jnp.float32)).astype(weight_dtype),
        "bias": jnp.zeros((1, vocab_size), jnp.float32),      # nn.Parameter(torch.zeros(vocab))
    }


def _reference(hidden_states, params):
    """Pure-JAX f32 reference mirroring the PyTorch forward."""
    w1 = params["w_dense"].astype(jnp.float32)
    w2 = params["w_dec"].astype(jnp.float32)
    h = hidden_states @ w1 + params["b_dense"][0]
    h = h * 0.5 * (1.0 + jax.lax.erf(h / jnp.sqrt(2.0)))
    mean = jnp.mean(h, axis=-1, keepdims=True)
    var = jnp.mean((h - mean) ** 2, axis=-1, keepdims=True)
    h = (h - mean) / jnp.sqrt(var + 1e-12)
    h = params["gamma"][0] * h + params["beta"][0]
    return h @ w2 + params["bias"][0]


if __name__ == "__main__":
    batch, seq_len, hidden_size, vocab_size = 2, 8, 32, 128

    key = jax.random.PRNGKey(0)
    kx, kp = jax.random.split(key)
    hidden_states = jax.random.normal(kx, (batch, seq_len, hidden_size), jnp.float32)

    # f32 path (defaults clamp to a single tile): tight check vs the reference.
    params_f32 = init_params(kp, hidden_size, vocab_size, weight_dtype=jnp.float32)
    ref = _reference(hidden_states, params_f32)
    out = jax.block_until_ready(masked_word_predictions(hidden_states, params_f32))
    assert out.shape == (batch, seq_len, vocab_size)
    assert jnp.allclose(out, ref, atol=1e-4, rtol=1e-4)

    # bf16 weight-streaming + bf16 logits path (halves weight + writeback HBM
    # traffic); validated against the f32 reference with a relaxed tolerance.
    params_bf16 = dict(params_f32)
    params_bf16["w_dense"] = params_f32["w_dense"].astype(jnp.bfloat16)
    params_bf16["w_dec"] = params_f32["w_dec"].astype(jnp.bfloat16)
    out_bf16 = jax.block_until_ready(
        masked_word_predictions(hidden_states, params_bf16, out_dtype=jnp.bfloat16))
    assert out_bf16.shape == (batch, seq_len, vocab_size)
    assert out_bf16.dtype == jnp.bfloat16
    assert jnp.allclose(out_bf16.astype(jnp.float32), ref, atol=5e-2, rtol=5e-2)

    # Multi-tile + ragged-vocab (padding) path at small scale: V=320 is not a
    # multiple of the 128-wide vocab tile, M=16 splits into two row tiles.
    vocab_ragged = 320
    params_rag = init_params(kp, hidden_size, vocab_ragged, weight_dtype=jnp.float32)
    ref_rag = _reference(hidden_states, params_rag)
    out_rag = jax.block_until_ready(
        masked_word_predictions(hidden_states, params_rag, tm=8, tn=128))
    assert out_rag.shape == (batch, seq_len, vocab_ragged)
    assert jnp.allclose(out_rag, ref_rag, atol=1e-4, rtol=1e-4)

    print("KERNEL_OK")
</pallas_src>

<mosaic_0001>
module attributes {stable_mosaic.version = 11 : i64} {
  func.func @_mlm_head_kernel(%arg0: i32, %arg1: i32, %arg2: memref<16x32xf32, #tpu.memory_space<vmem>>, %arg3: memref<32x32xf32, #tpu.memory_space<vmem>>, %arg4: memref<1x32xf32, #tpu.memory_space<vmem>>, %arg5: memref<1x32xf32, #tpu.memory_space<vmem>>, %arg6: memref<1x32xf32, #tpu.memory_space<vmem>>, %arg7: memref<32x128xf32, #tpu.memory_space<vmem>>, %arg8: memref<1x128xf32, #tpu.memory_space<vmem>>, %arg9: memref<16x128xf32, #tpu.memory_space<vmem>>, %arg10: memref<16x32xf32, #tpu.memory_space<vmem>>) attributes {dimension_semantics = [#tpu.dimension_semantics<parallel>, #tpu.dimension_semantics<arbitrary>], iteration_bounds = array<i64: 1, 1>, scalar_prefetch = 0 : i64, scratch_operands = 1 : i64, tpu.core_type = #tpu.core_type<tc>, window_params = [{transform_indices = @transform_0, window_bounds = array<i64: 16, 32>}, {pipeline_mode = #tpu.pipeline_mode<synchronous>, transform_indices = @transform_1, window_bounds = array<i64: 32, 32>}, {pipeline_mode = #tpu.pipeline_mode<synchronous>, transform_indices = @transform_2, window_bounds = array<i64: 1, 32>}, {pipeline_mode = #tpu.pipeline_mode<synchronous>, transform_indices = @transform_3, window_bounds = array<i64: 1, 32>}, {pipeline_mode = #tpu.pipeline_mode<synchronous>, transform_indices = @transform_4, window_bounds = array<i64: 1, 32>}, {transform_indices = @transform_5, window_bounds = array<i64: 32, 128>}, {transform_indices = @transform_6, window_bounds = array<i64: 1, 128>}, {transform_indices = @transform_7, window_bounds = array<i64: 16, 128>}]} {
    %c0_i32 = arith.constant 0 : i32
    %0 = arith.cmpi eq, %arg1, %c0_i32 : i32
    %1 = arith.extui %0 : i1 to i32
    %c0_i32_0 = arith.constant 0 : i32
    %2 = arith.cmpi ne, %1, %c0_i32_0 : i32
    scf.if %2 {
      %c0_8 = arith.constant 0 : index
      %c0_9 = arith.constant 0 : index
      %10 = vector.load %arg2[%c0_8, %c0_9] : memref<16x32xf32, #tpu.memory_space<vmem>>, vector<16x32xf32>
      %c0_10 = arith.constant 0 : index
      %c0_11 = arith.constant 0 : index
      %11 = vector.load %arg3[%c0_10, %c0_11] : memref<32x32xf32, #tpu.memory_space<vmem>>, vector<32x32xf32>
      %cst_12 = arith.constant dense<0.000000e+00> : vector<16x32xf32>
      %12 = tpu.matmul %10, %11, %cst_12 {dimension_numbers = #tpu.dot_dimension_numbers<[1], [0], [0], [1], [0, 0, 1, 1], [], []>} : vector<16x32xf32>, vector<32x32xf32>, vector<16x32xf32> -> vector<16x32xf32>
      %c0_13 = arith.constant 0 : index
      %c0_14 = arith.constant 0 : index
      %13 = vector.load %arg4[%c0_13, %c0_14] : memref<1x32xf32, #tpu.memory_space<vmem>>, vector<1x32xf32>
      %14 = vector.broadcast %13 : vector<1x32xf32> to vector<16x32xf32>
      %15 = arith.addf %12, %14 : vector<16x32xf32>
      %cst_15 = arith.constant 5.000000e-01 : f32
      %16 = vector.broadcast %cst_15 : f32 to vector<16x32xf32>
      %17 = arith.mulf %15, %16 : vector<16x32xf32>
      %cst_16 = arith.constant 0.707106769 : f32
      %18 = vector.broadcast %cst_16 : f32 to vector<16x32xf32>
      %19 = arith.mulf %15, %18 : vector<16x32xf32>
      %20 = math.erf %19 : vector<16x32xf32>
      %cst_17 = arith.constant 1.000000e+00 : f32
      %21 = vector.broadcast %cst_17 : f32 to vector<16x32xf32>
      %22 = arith.addf %21, %20 : vector<16x32xf32>
      %23 = arith.mulf %17, %22 : vector<16x32xf32>
      %cst_18 = arith.constant dense<0.000000e+00> : vector<16xf32>
      %24 = vector.multi_reduction <add>, %23, %cst_18 [1] : vector<16x32xf32> to vector<16xf32>
      %25 = vector.shape_cast %24 : vector<16xf32> to vector<16x1xf32>
      %cst_19 = arith.constant 3.200000e+01 : f32
      %26 = vector.broadcast %cst_19 : f32 to vector<16x1xf32>
      %27 = arith.divf %25, %26 : vector<16x1xf32>
      %28 = vector.broadcast %27 : vector<16x1xf32> to vector<16x32xf32>
      %29 = arith.subf %23, %28 : vector<16x32xf32>
      %30 = arith.mulf %29, %29 : vector<16x32xf32>
      %cst_20 = arith.constant dense<0.000000e+00> : vector<16xf32>
      %31 = vector.multi_reduction <add>, %30, %cst_20 [1] : vector<16x32xf32> to vector<16xf32>
      %32 = vector.shape_cast %31 : vector<16xf32> to vector<16x1xf32>
      %cst_21 = arith.constant 3.200000e+01 : f32
      %33 = vector.broadcast %cst_21 : f32 to vector<16x1xf32>
      %34 = arith.divf %32, %33 : vector<16x1xf32>
      %35 = vector.broadcast %27 : vector<16x1xf32> to vector<16x32xf32>
      %36 = arith.subf %23, %35 : vector<16x32xf32>
      %cst_22 = arith.constant 9.99999996E-13 : f32
      %37 = vector.broadcast %cst_22 : f32 to vector<16x1xf32>
      %38 = arith.addf %34, %37 : vector<16x1xf32>
      %39 = math.rsqrt %38 : vector<16x1xf32>
      %40 = vector.broadcast %39 : vector<16x1xf32> to vector<16x32xf32>
      %41 = arith.mulf %36, %40 : vector<16x32xf32>
      %c0_23 = arith.constant 0 : index
      %c0_24 = arith.constant 0 : index
      %42 = vector.load %arg5[%c0_23, %c0_24] : memref<1x32xf32, #tpu.memory_space<vmem>>, vector<1x32xf32>
      %43 = vector.broadcast %42 : vector<1x32xf32> to vector<16x32xf32>
      %44 = arith.mulf %43, %41 : vector<16x32xf32>
      %c0_25 = arith.constant 0 : index
      %c0_26 = arith.constant 0 : index
      %45 = vector.load %arg6[%c0_25, %c0_26] : memref<1x32xf32, #tpu.memory_space<vmem>>, vector<1x32xf32>
      %46 = vector.broadcast %45 : vector<1x32xf32> to vector<16x32xf32>
      %47 = arith.addf %44, %46 : vector<16x32xf32>
      %c0_27 = arith.constant 0 : index
      %c0_28 = arith.constant 0 : index
      %48 = vector.load %arg10[%c0_27, %c0_28] : memref<16x32xf32, #tpu.memory_space<vmem>>, vector<16x32xf32>
      tpu.vector_store %arg10[%c0_27, %c0_28], %47 {strides = array<i32>} : memref<16x32xf32, #tpu.memory_space<vmem>>, vector<16x32xf32>,
    } else {
    }
    %c0 = arith.constant 0 : index
    %c0_1 = arith.constant 0 : index
    %3 = vector.load %arg10[%c0, %c0_1] : memref<16x32xf32, #tpu.memory_space<vmem>>, vector<16x32xf32>
    %c0_2 = arith.constant 0 : index
    %c0_3 = arith.constant 0 : index
    %4 = vector.load %arg7[%c0_2, %c0_3] : memref<32x128xf32, #tpu.memory_space<vmem>>, vector<32x128xf32>
    %cst = arith.constant dense<0.000000e+00> : vector<16x128xf32>
    %5 = tpu.matmul %3, %4, %cst {dimension_numbers = #tpu.dot_dimension_numbers<[1], [0], [0], [1], [0, 0, 1, 1], [], []>} : vector<16x32xf32>, vector<32x128xf32>, vector<16x128xf32> -> vector<16x128xf32>
    %c0_4 = arith.constant 0 : index
    %c0_5 = arith.constant 0 : index
    %6 = vector.load %arg8[%c0_4, %c0_5] : memref<1x128xf32, #tpu.memory_space<vmem>>, vector<1x128xf32>
    %7 = vector.broadcast %6 : vector<1x128xf32> to vector<16x128xf32>
    %8 = arith.addf %5, %7 : vector<16x128xf32>
    %c0_6 = arith.constant 0 : index
    %c0_7 = arith.constant 0 : index
    %9 = vector.load %arg9[%c0_6, %c0_7] : memref<16x128xf32, #tpu.memory_space<vmem>>, vector<16x128xf32>
    tpu.vector_store %arg9[%c0_6, %c0_7], %8 {strides = array<i32>} : memref<16x128xf32, #tpu.memory_space<vmem>>, vector<16x128xf32>,
    return
  }
  func.func @transform_0(%arg0: i32, %arg1: i32) -> (i32, i32) {
    %c0_i32 = arith.constant 0 : i32
    %c0_i32_0 = arith.constant 0 : i32
    return %arg0, %c0_i32 : i32, i32
  }
  func.func @transform_1(%arg0: i32, %arg1: i32) -> (i32, i32) {
    %c0_i32 = arith.constant 0 : i32
    %c0_i32_0 = arith.constant 0 : i32
    %c0_i32_1 = arith.constant 0 : i32
    return %c0_i32, %c0_i32_0 : i32, i32
  }
  func.func @transform_2(%arg0: i32, %arg1: i32) -> (i32, i32) {
    %c0_i32 = arith.constant 0 : i32
    %c0_i32_0 = arith.constant 0 : i32
    %c0_i32_1 = arith.constant 0 : i32
    return %c0_i32, %c0_i32_0 : i32, i32
  }
  func.func @transform_3(%arg0: i32, %arg1: i32) -> (i32, i32) {
    %c0_i32 = arith.constant 0 : i32
    %c0_i32_0 = arith.constant 0 : i32
    %c0_i32_1 = arith.constant 0 : i32
    return %c0_i32, %c0_i32_0 : i32, i32
  }
  func.func @transform_4(%arg0: i32, %arg1: i32) -> (i32, i32) {
    %c0_i32 = arith.constant 0 : i32
    %c0_i32_0 = arith.constant 0 : i32
    %c0_i32_1 = arith.constant 0 : i32
    return %c0_i32, %c0_i32_0 : i32, i32
  }
  func.func @transform_5(%arg0: i32, %arg1: i32) -> (i32, i32) {
    %c0_i32 = arith.constant 0 : i32
    %c0_i32_0 = arith.constant 0 : i32
    return %c0_i32, %arg1 : i32, i32
  }
  func.func @transform_6(%arg0: i32, %arg1: i32) -> (i32, i32) {
    %c0_i32 = arith.constant 0 : i32
    %c0_i32_0 = arith.constant 0 : i32
    return %c0_i32, %arg1 : i32, i32
  }
  func.func @transform_7(%arg0: i32, %arg1: i32) -> (i32, i32) {
    %c0_i32 = arith.constant 0 : i32
    return %arg0, %arg1 : i32, i32
  }
}

</mosaic_0001>

<bundles_post_ra>
// kernel: tpu_custom_call.1
= control target key start
LH: loop header
LB: loop body
LE: loop exit
PB: predicated region body
PF: predicated region fallthrough
CT: control target
= control target key end

     0   :  { %12 = vsyncpa [#allocation4], 0  ;;  %s640_s0 = inlined_call_operand.hbm [shape: f32[16,32], index: 0, kind: input, shape index: {}]   ;;  %s641_s1 = inlined_call_operand.hbm [shape: f32[32,32], index: 1, kind: input, shape index: {}]   ;;  %s642_s2 = inlined_call_operand.vmem [shape: f32[1,32], index: 2, kind: input, shape index: {}]   ;;  %s643_s3 = inlined_call_operand.vmem [shape: f32[1,32], index: 3, kind: input, shape index: {}]   ;;  %s644_s4 = inlined_call_operand.vmem [shape: f32[1,32], index: 4, kind: input, shape index: {}]   ;;  %s645_s5 = inlined_call_operand.hbm [shape: f32[32,128], index: 5, kind: input, shape index: {}]   ;;  %s646_s6 = inlined_call_operand.vmem [shape: f32[1,128], index: 6, kind: input, shape index: {}]   ;;  %s647_s7 = inlined_call_operand.hbm [shape: f32[16,128], index: 7, kind: output, shape index: {}]  }
   0x1   :  { %13 = vsyncpa [#allocation7], 0 }
   0x2   :  { %14 = vsyncpa [#allocation5], 0  ;;  %s505_s24 = smov [#allocation6]   ;;  %s506_s26 = smov [#allocation3]  }
   0x3   :  { %s32_s25 = sshll.u32 %s505_s24, 4  ;;  %s20_s27 = sshll.u32 %s506_s26, 4  ;;  %s33_s25 = int_to_ptr.vmem [resolvable:$true] %s32_s25  ;;  %s551_s27 = int_to_ptr.vmem [resolvable:$true] %s20_s27 }
   0x4   :  { %s411_s30 = scalar_lea.hbm %s641_s1, 512 }
   0x5   :  { %p412_p0 = scmp.ne.s32.totalorder %s641_s1, %s411_s30  ;;  %p415_p1 = scmp.lt.u32.totalorder %s411_s30, %s641_s1 }
   0x7   :  { %p417_p2 = pnand %p415_p1, %p412_p0 }
   0x9   :  { %420 = shalt.err (!%p417_p2)
}
   0xa   :  { %s421_s12 = scalar_lea.vmem %s33_s25, 512  ;;  %p426_p4 = scmp.lt.s32.totalorder %s33_s25, %s33_s25 }
   0xb   :  { %p422_p3 = scmp.ne.s32.totalorder %s33_s25, %s421_s12  ;;  %p427_p5 = scmp.lt.s32.totalorder %s421_s12, %s421_s12 }
   0xd   :  { %p428_p6 = por %p427_p5, %p426_p4 }
   0xf   :  { %p429_p7 = pnand %p428_p6, %p422_p3 }
  0x11   :  { %432 = shalt.err (!%p429_p7)
}
  0x12   :  { %s507_s13 = smov 128   ;;  %s508_s14 = smov 8  }
  0x13   :  { %38 = dma.hbm_to_vmem [thread:$0]  %s641_s1, 512, %s33_s25, [#allocation7], %s507_s13, %s507_s13, %s508_s14  }
  0x14   :  { %s433_s19 = scalar_lea.hbm %s640_s0, 256 }
  0x15   :  { %p434_p8 = scmp.ne.s32.totalorder %s640_s0, %s433_s19  ;;  %p437_p9 = scmp.lt.u32.totalorder %s433_s19, %s640_s0 }
  0x17   :  { %p439_p10 = pnand %p437_p9, %p434_p8 }
  0x19   :  { %442 = shalt.err (!%p439_p10)
}
  0x1a   :  { %s443_s24 = scalar_lea.vmem %s551_s27, 256  ;;  %p448_p12 = scmp.lt.s32.totalorder %s551_s27, %s551_s27 }
  0x1b   :  { %p444_p11 = scmp.ne.s32.totalorder %s551_s27, %s443_s24  ;;  %p449_p13 = scmp.lt.s32.totalorder %s443_s24, %s443_s24 }
  0x1d   :  { %p450_p0 = por %p449_p13, %p448_p12 }
  0x1f   :  { %p451_p1 = pnand %p450_p0, %p444_p11 }
  0x21   :  { %454 = shalt.err (!%p451_p1)
}
  0x22   :  { %26 = dma.hbm_to_vmem [thread:$0]  %s640_s0, 256, %s551_s27, [#allocation4], %s507_s13, %s507_s13, %s508_s14  }
  0x23   :  { %s509_s26 = smov [#allocation8]   ;;  %s455_s8 = scalar_lea.hbm %s645_s5, 512 }
  0x24   :  { %s50_s28 = sshll.u32 %s509_s26, 4  ;;  %p456_p2 = scmp.ne.s32.totalorder %s645_s5, %s455_s8  ;;  %s51_s28 = int_to_ptr.vmem [resolvable:$true] %s50_s28 }
  0x25   :  { %p459_p3 = scmp.lt.u32.totalorder %s455_s8, %s645_s5 }
  0x27   :  { %p461_p4 = pnand %p459_p3, %p456_p2 }
  0x29   :  { %464 = shalt.err (!%p461_p4)
}
  0x2a   :  { %s465_s15 = scalar_lea.vmem %s51_s28, 512  ;;  %p470_p6 = scmp.lt.s32.totalorder %s51_s28, %s51_s28 }
  0x2b   :  { %p466_p5 = scmp.ne.s32.totalorder %s51_s28, %s465_s15  ;;  %p471_p7 = scmp.lt.s32.totalorder %s465_s15, %s465_s15 }
  0x2d   :  { %p472_p8 = por %p471_p7, %p470_p6 }
  0x2f   :  { %p473_p9 = pnand %p472_p8, %p466_p5 }
  0x31   :  { %476 = shalt.err (!%p473_p9)
}
  0x32   :  { %56 = dma.hbm_to_vmem [thread:$0]  %s645_s5, 512, %s51_s28, [#allocation7], %s507_s13, %s507_s13, %s508_s14  }
  0x33   :  { %499 = dma.done.wait [#allocation4], 256  }
  0x34   :  { %500 = vsyncadd [#allocation4], 4294967040 }
  0x35   :  { %501 = dma.done.wait [#allocation7], 1024  }
  0x36   :  { %502 = vsyncadd [#allocation7], 4294966272  ;;  %vm85_vm0 = vcmask 261120   ;;  %v74_v0 = vld [vmem:[#allocation6] sm:$0xff]  ;;  %v75_v1 = vld [vmem:[#allocation6 + $0x8] sm:$0xff] }
  0x37   :  { %v76_v2 = vld [vmem:[#allocation6 + $0x10] sm:$0xff]  ;;  %v381_v3 = vpack.c.bf16 %v75_v1, %v74_v0  ;;  %v77_v4 = vld [vmem:[#allocation6 + $0x18] sm:$0xff]  ;;  %v339_v8 = vld [vmem:[%s642_s2] ss:$0 sm:$0xff] }
  0x38   :  { %v72_v5 = vld [vmem:[#allocation3] sm:$0xff]  ;;  %v385_v6 = vpack.c.bf16 %v77_v4, %v76_v2  ;;  %v73_v7 = vld [vmem:[#allocation3 + $0x8] sm:$0xff]  ;;  %v226_v35 = vld [vmem:[#allocation8] sm:$0xff] }
  0x39   :  { %367 = vmatprep.mubr.msk.f32.mxu0 %vm85_vm0, %v72_v5  ;;  %382 = vmatprep.subr.bf16.mxu0 %v381_v3  ;;  %v227_v36 = vld [vmem:[#allocation8 + $0x8] sm:$0xff]  ;;  %v228_v38 = vld [vmem:[#allocation8 + $0x10] sm:$0xff]  ;;  %v229_v39 = vld [vmem:[#allocation8 + $0x18] sm:$0xff] }
  0x3a   :  { %384 = vmatpush3.bf16.msra.mxu0 %v381_v3  ;;  %v389_v37 = vpack.c.bf16 %v227_v36, %v226_v35  ;;  %v393_v40 = vpack.c.bf16 %v229_v39, %v228_v38  ;;  %v342_v48 = vld [vmem:[%s643_s3] ss:$0 sm:$0xff] }
  0x3b   :  { %386 = vmatprep.subr.bf16.mxu0 %v385_v6  ;;  %v343_v50 = vld [vmem:[%s644_s4] ss:$0 sm:$0xff]  ;;  %s510_s4 = smov [#allocation9]  }
  0x3c   :  { %390 = vmatprep.subr.bf16.mxu1 %v389_v37  ;;  %v344_v59 = vld [vmem:[%s646_s6] ss:$0 sm:$0xff]  ;;  %s326_s21 = sshll.u32 %s510_s4, 4  ;;  %s327_s21 = int_to_ptr.vmem [resolvable:$true] %s326_s21 }
  0x3d   :  { %392 = vmatpush3.bf16.msra.mxu1 %v389_v37  ;;  %s477_s22 = scalar_lea.vmem %s327_s21, 256  ;;  %p482_p11 = scmp.lt.s32.totalorder %s327_s21, %s327_s21 }
  0x3e   :  { %388 = vmatpush3.bf16.msra.mxu0 %v385_v6  ;;  %394 = vmatprep.subr.bf16.mxu1 %v393_v40  ;;  %p478_p10 = scmp.ne.s32.totalorder %s327_s21, %s477_s22  ;;  %p483_p12 = scmp.lt.s32.totalorder %s477_s22, %s477_s22 }
  0x40   :  { %p484_p13 = por %p483_p12, %p482_p11 }
  0x41   :  { %368 = vmatmul.mubr.msk.f32.vlgmr.msra.gmra.mrb[0].mxu0 %vm85_vm0, %v73_v7  ;;  %396 = vmatpush3.bf16.msra.mxu1 %v393_v40 }
  0x42   :  { %p485_p0 = pnand %p484_p13, %p478_p10 }
 0x114   :  { %v369_v9 = vpop.f32.mrb[0].mxu0 }
 0x115   :  { %v164_v10 = vadd.f32 %v369_v9, %v339_v8  ;;  %v158_v11 = vpop.f32.mrb[1].mxu0 }
 0x116   :  { %v159_v12 = vadd.f32 %v339_v8, %v158_v11 }
 0x117   :  { %v170_v13 = vmul.f32 0.70710677, %v164_v10  ;;  %v168_v20 = vmul.f32 0.5, %v164_v10 }
 0x118   :  { %v169_v14 = vmul.f32 0.70710677, %v159_v12  ;;  %v167_v17 = vmul.f32 0.5, %v159_v12 }
 0x119   :  { %403 = verf.f32 %v170_v13 }
 0x11a   :  { %405 = verf.f32 %v169_v14 }
 0x123   :  { %v404_v15 = vpop.eup %403 }
 0x124   :  { %v406_v16 = vpop.eup %405  ;;  %v174_v19 = vadd.f32 1.0, %v404_v15 }
 0x125   :  { %v173_v18 = vadd.f32 1.0, %v406_v16 }
 0x126   :  { %v176_v23 = vmul.f32 %v174_v19, %v168_v20 }
 0x127   :  { %v175_v21 = vmul.f32 %v173_v18, %v167_v17 }
 0x128   :  { %v180_v24 = vsel %vm85_vm0, %v176_v23, 0.0 }
 0x129   :  { %v177_v22 = vsel %vm85_vm0, %v175_v21, 0.0 }
 0x12a   :  { %178 = vadd.xlane.f32.xlu0 %v177_v22 }
 0x12e   :  { %181 = vadd.xlane.f32.xlu0 %v180_v24 }
 0x1b7   :  { %v179_v25 = vpop.xlane.xlu0 %178 }
 0x1b8   :  { %v184_v26 = vmul.f32 0.03125, %v179_v25 }
 0x1ba   :  { %v186_v27 = vsub.f32 %v175_v21, %v184_v26 }
 0x1bb   :  { %v182_v28 = vpop.xlane.xlu0 %181 }
 0x1bc   :  { %v185_v29 = vmul.f32 0.03125, %v182_v28  ;;  %v188_v30 = vmul.f32 %v186_v27, %v186_v27 }
 0x1be   :  { %v187_v31 = vsub.f32 %v176_v23, %v185_v29  ;;  %v190_v32 = vsel %vm85_vm0, %v188_v30, 0.0 }
 0x1bf   :  { %191 = vadd.xlane.f32.xlu1 %v190_v32 }
 0x1c0   :  { %v189_v33 = vmul.f32 %v187_v31, %v187_v31 }
 0x1c2   :  { %v193_v34 = vsel %vm85_vm0, %v189_v33, 0.0 }
 0x1c3   :  { %194 = vadd.xlane.f32.xlu1 %v193_v34 }
 0x24c   :  { %v192_v41 = vpop.xlane.xlu1 %191 }
 0x24d   :  { %v196_v42 = vmul.f32 0.03125, %v192_v41 }
 0x24f   :  { %v198_v43 = vadd.f32 1e-12, %v196_v42 }
 0x250   :  { %v195_v44 = vpop.xlane.xlu1 %194 }
 0x251   :  { %407 = vrsqrt.f32 %v198_v43  ;;  %v197_v45 = vmul.f32 0.03125, %v195_v44 }
 0x253   :  { %v199_v46 = vadd.f32 1e-12, %v197_v45 }
 0x255   :  { %409 = vrsqrt.f32 %v199_v46 }
 0x25b   :  { %v408_v47 = vpop.eup %407 }
 0x25c   :  { %v202_v49 = vmul.f32 %v408_v47, %v186_v27 }
 0x25e   :  { %v211_v51 = vmul.f32 %v342_v48, %v202_v49 }
 0x25f   :  { %v410_v52 = vpop.eup %409 }
 0x260   :  { %v220_v53 = vadd.f32 %v343_v50, %v211_v51  ;;  %v203_v54 = vmul.f32 %v410_v52, %v187_v31 }
 0x262   :  { %222 = vst.msk [vmem:[#allocation2] sm:$0xff] %vm85_vm0, %v220_v53  ;;  %v212_v55 = vmul.f32 %v342_v48, %v203_v54 }
 0x264   :  { %v221_v56 = vadd.f32 %v343_v50, %v212_v55 }
 0x266   :  { %223 = vst.msk [vmem:[#allocation2 + $0x8] sm:$0xff] %vm85_vm0, %v221_v56 }
 0x269   :  { %v224_v57 = vld [vmem:[#allocation2] sm:$0xff] }
 0x26a   :  { %378 = vmatprep.mubr.msk.f32.mxu1 %vm85_vm0, %v224_v57 }
 0x26d   :  { %v225_v58 = vld [vmem:[#allocation2 + $0x8] sm:$0xff] }
 0x26e   :  { %379 = vmatmul.mubr.msk.f32.vlgmr.msra.gmra.mrb[0].mxu1 %vm85_vm0, %v225_v58 }
 0x341   :  { %v380_v60 = vpop.f32.mrb[0].mxu1 }
 0x342   :  { %v316_v61 = vadd.f32 %v380_v60, %v344_v59  ;;  %v310_v62 = vpop.f32.mrb[1].mxu1 }
 0x343   :  { %v311_v63 = vadd.f32 %v344_v59, %v310_v62 }
 0x344   :  { %320 = vst [vmem:[#allocation9 + $0x8] sm:$0xff] %v316_v61 }
 0x345   :  { %319 = vst [vmem:[#allocation9] sm:$0xff] %v311_v63 }
 0x346   :  { %488 = shalt.err (!%p485_p0)
}
 0x347   :  { %s489_s6 = scalar_lea.hbm %s647_s7, 256 }
 0x348   :  { %p490_p1 = scmp.ne.s32.totalorder %s647_s7, %s489_s6  ;;  %p493_p2 = scmp.lt.u32.totalorder %s489_s6, %s647_s7 }
 0x34a   :  { %p495_p3 = pnand %p493_p2, %p490_p1 }
 0x34c   :  { %498 = shalt.err (!%p495_p3)
}
 0x34d   :  { %332 = dma.vmem_to_hbm [thread:$0]  %s327_s21, 256, %s647_s7, [#allocation5], %s507_s13, %s507_s13, %s508_s14  }
 0x34e   :  { %503 = dma.done.wait [#allocation5], 256  }
 0x34f   :  { %504 = vsyncadd [#allocation5], 4294967040 }
 0x350   :  { %336 = vsyncpa [#allocation4], 1 }
 0x351   :  { %337 = vsyncpa [#allocation7], 1 }
 0x352   :  { %338 = vsyncpa [#allocation5], 1 }

</bundles_post_ra>
